<compile_context>
chip_gen: v5e
topology: v5e:2x2
jax: 0.10.0
libtpu: 0.0.40
codegen_flags: <defaults>
</compile_context>

<pallas_src>
import functools

import jax
import jax.numpy as jnp
from jax.experimental import pallas as pl
from jax.experimental.pallas import tpu as pltpu


def _round_up(a, b):
    return (a + b - 1) // b * b


# --------------------------------------------------------------------------
# Kernel bodies
# --------------------------------------------------------------------------
def _gated_partial(x, w1_ref, wg_ref, w2_ref, inner_chunks):
    """silu(x @ w1) * (x @ wg) @ w2 for one ffn tile, chunked along F.

    Chunking breaks the serial MXU -> EUP/VALU -> MXU dependency so the LLO
    scheduler can overlap chunk c+1's up-projection with chunk c's silu/gate.
    Slices are static multiples of 128 lanes -> no layout copies.
    """
    tf = w1_ref.shape[-1]
    n = inner_chunks if (inner_chunks >= 1 and tf % inner_chunks == 0) else 1
    cf = tf // n
    acc = None
    for c in range(n):
        lo = c * cf
        h = jnp.dot(x, w1_ref[:, lo:lo + cf], preferred_element_type=jnp.float32)
        g = jnp.dot(x, wg_ref[:, lo:lo + cf], preferred_element_type=jnp.float32)
        # torch: activation_fn(h.float()).type_as(x) * g   (swish / silu)
        act = (h * pl.reciprocal(1.0 + jnp.exp(-h))).astype(x.dtype)
        gated = act * g.astype(x.dtype)
        part = jnp.dot(gated, w2_ref[lo:lo + cf, :],
                       preferred_element_type=jnp.float32)
        acc = part if acc is None else acc + part
    return acc


def _glu_kernel_single(x_ref, w1_ref, wg_ref, w2_ref, o_ref, *, inner_chunks):
    """Single ffn tile: weights are grid-resident, no accumulator round-trip."""
    o_ref[...] = _gated_partial(
        x_ref[...], w1_ref, wg_ref, w2_ref, inner_chunks).astype(o_ref.dtype)


def _glu_kernel_acc(x_ref, w1_ref, wg_ref, w2_ref, o_ref, acc_ref, *, inner_chunks):
    """F-tiled: f32 accumulator across the (last, 'arbitrary') ffn grid axis."""
    j = pl.program_id(1)

    @pl.when(j == 0)
    def _init():
        acc_ref[...] = jnp.zeros_like(acc_ref)

    acc_ref[...] += _gated_partial(x_ref[...], w1_ref, wg_ref, w2_ref,
                                   inner_chunks)

    @pl.when(j == pl.num_programs(1) - 1)
    def _store():
        o_ref[...] = acc_ref[...].astype(o_ref.dtype)


# --------------------------------------------------------------------------
# Tiling / VMEM budgeting
# --------------------------------------------------------------------------
def _usable_vmem_bytes():
    cap = 64 * 1024 * 1024
    try:
        info = pltpu.get_tpu_info()
        cap = int(getattr(info, "vmem_capacity_bytes", cap))
    except Exception:
        pass
    if cap <= 64 * 1024 * 1024:          # v7x-class (64 MiB/TC): leave headroom
        usable = cap - 12 * 1024 * 1024
    else:                                # v5e/v6e 128 MiB parts: use ~104 MiB
        usable = cap - 24 * 1024 * 1024
    return max(usable, 24 * 1024 * 1024)


def _pick_tiles(M, E, F, itemsize, tm_req, tf_req, inner_req, usable_vmem):
    sub = {4: 8, 2: 16, 1: 32}.get(itemsize, 8)
    Fp128 = _round_up(F, 128)
    slack = 6 * 1024 * 1024              # compiler scratch / DMA descriptors

    # Row tile: default 512, rounded to MXU-friendly multiples of 128 (sublane
    # multiple for small/ragged M), never larger than the padded row count.
    tm = 512 if tm_req is None else int(tm_req)
    tm = max(sub, min(tm, _round_up(M, sub)))
    tm = _round_up(tm, 128) if tm >= 128 else _round_up(tm, sub)

    # ffn tile candidates: full (single tile, weights DMA'd exactly once) first,
    # then 128-multiples that divide the 128-padded F (no extra zero padding).
    if tf_req is not None:
        cand_list = [min(_round_up(int(tf_req), 128), Fp128)]
    else:
        smaller = [c for c in (2048, 1024, 512, 256, 128) if c < Fp128]
        cand_list = ([Fp128]
                     + [c for c in smaller if Fp128 % c == 0]
                     + [c for c in smaller if Fp128 % c != 0])

    def pick_ic(tf_):
        ic = (2 if tf_ >= 256 else 1) if inner_req is None else int(inner_req)
        if ic < 1 or tf_ % ic != 0 or (tf_ // ic) % 128 != 0:
            ic = 1
        return ic

    def est(tm_, tf_, ic_):
        cf = tf_ // max(ic_, 1)
        blocks = (2 * tm_ * E            # x   (double-buffered)
                  + 2 * tm_ * E          # out (double-buffered)
                  + 2 * 2 * E * tf_      # fc1 + gate weight slabs
                  + 2 * tf_ * E          # fc2 weight slab
                  ) * itemsize
        acc = tm_ * E * 4                # f32 accumulator (scratch or live)
        interm = 4 * tm_ * cf * 4        # h, g, act, gated per chunk
        return blocks + acc + interm

    while True:
        for cand in cand_list:
            ic = pick_ic(cand)
            if tf_req is not None or est(tm, cand, ic) + slack <= usable_vmem:
                return tm, cand, ic, est(tm, cand, ic)
        if tm > 128:                     # shrink row tile before giving up
            tm = max(128, (tm // 2) // 128 * 128)
        else:
            cand = cand_list[-1]
            ic = pick_ic(cand)
            return tm, cand, ic, est(tm, cand, ic)


# --------------------------------------------------------------------------
# Forward wrapper
# --------------------------------------------------------------------------
def glu_forward(x, w_fc1, w_gate, w_fc2, *, tm=None, tf=None,
                inner_chunks=None, matmul_dtype=None):
    """x: (..., E); w_fc1/(E,F), w_gate/(E,F), w_fc2/(F,E) (x @ W layout)."""
    x_shape = x.shape
    E = x_shape[-1]
    F = w_fc1.shape[1]
    out_dtype = x.dtype

    x2d = x.reshape(-1, E)
    M = x2d.shape[0]

    # Optional reduced-precision matmuls (e.g. matmul_dtype=jnp.bfloat16):
    # silu stays f32 and accumulation stays f32 inside the kernel.
    if matmul_dtype is not None:
        x2d = x2d.astype(matmul_dtype)
    w_fc1 = w_fc1.astype(x2d.dtype)
    w_gate = w_gate.astype(x2d.dtype)
    w_fc2 = w_fc2.astype(x2d.dtype)
    itemsize = jnp.dtype(x2d.dtype).itemsize

    usable_vmem = _usable_vmem_bytes()
    tm, tf, inner_chunks, vmem_est = _pick_tiles(
        M, E, F, itemsize, tm, tf, inner_chunks, usable_vmem)

    Mp = _round_up(M, tm)
    Fp = _round_up(F, tf)
    nM = Mp // tm
    nF = Fp // tf

    # No weight repacking: only zero-pad ragged dims (exact: silu(0)*0 == 0 and
    # the padded fc2 rows are zero; padded x rows are sliced off below).
    if Mp != M:
        x2d = jnp.pad(x2d, ((0, Mp - M), (0, 0)))
    if Fp != F:
        w_fc1 = jnp.pad(w_fc1, ((0, 0), (0, Fp - F)))
        w_gate = jnp.pad(w_gate, ((0, 0), (0, Fp - F)))
        w_fc2 = jnp.pad(w_fc2, ((0, Fp - F), (0, 0)))

    cost = pl.CostEstimate(
        flops=int(6 * Mp * E * Fp),                  # 3 matmuls of 2*M*E*F
        transcendentals=int(Mp * Fp),                # sigmoid
        bytes_accessed=int((2 * Mp * E + nM * 3 * E * Fp) * itemsize),
    )
    vmem_limit = int(min(usable_vmem,
                         max(vmem_est + 16 * 1024 * 1024, 32 * 1024 * 1024)))

    # TODO(synk): dropout / activation_dropout are identity in eval mode; not modeled.
    # TODO(synk): on v7x with a single row tile, shard the F reduction across the
    # two TensorCores (partial accumulators) instead of the row axis.
    common = dict(
        out_shape=jax.ShapeDtypeStruct((Mp, E), out_dtype),
        cost_estimate=cost,
    )

    if nF == 1:
        out = pl.pallas_call(
            functools.partial(_glu_kernel_single, inner_chunks=inner_chunks),
            grid_spec=pltpu.PrefetchScalarGridSpec(
                num_scalar_prefetch=0,
                grid=(nM,),
                in_specs=[
                    pl.BlockSpec((tm, E), lambda i: (i, 0)),   # x row tile
                    pl.BlockSpec((E, tf), lambda i: (0, 0)),   # fc1 (resident)
                    pl.BlockSpec((E, tf), lambda i: (0, 0)),   # gate (resident)
                    pl.BlockSpec((tf, E), lambda i: (0, 0)),   # fc2 (resident)
                ],
                out_specs=pl.BlockSpec((tm, E), lambda i: (i, 0)),
            ),
            compiler_params=pltpu.CompilerParams(
                dimension_semantics=("parallel",),
                vmem_limit_bytes=vmem_limit,
            ),
            **common,
        )(x2d, w_fc1, w_gate, w_fc2)
    else:
        out = pl.pallas_call(
            functools.partial(_glu_kernel_acc, inner_chunks=inner_chunks),
            grid_spec=pltpu.PrefetchScalarGridSpec(
                num_scalar_prefetch=0,
                grid=(nM, nF),
                in_specs=[
                    pl.BlockSpec((tm, E), lambda i, j: (i, 0)),   # x row tile
                    pl.BlockSpec((E, tf), lambda i, j: (0, j)),   # fc1 cols
                    pl.BlockSpec((E, tf), lambda i, j: (0, j)),   # gate cols
                    pl.BlockSpec((tf, E), lambda i, j: (j, 0)),   # fc2 rows
                ],
                out_specs=pl.BlockSpec((tm, E), lambda i, j: (i, 0)),
                scratch_shapes=[pltpu.VMEM((tm, E), jnp.float32)],
            ),
            compiler_params=pltpu.CompilerParams(
                dimension_semantics=("parallel", "arbitrary"),
                vmem_limit_bytes=vmem_limit,
            ),
            **common,
        )(x2d, w_fc1, w_gate, w_fc2)

    if Mp != M:
        out = out[:M]
    return out.reshape(x_shape)


# --------------------------------------------------------------------------
# Reference + demo
# --------------------------------------------------------------------------
def _init_linear_weight(key, in_features, out_features, dtype=jnp.float32):
    # Mirrors torch.nn.Linear default init U(-1/sqrt(in), 1/sqrt(in)),
    # stored as (in, out) for the kernel's x @ W layout.
    bound = 1.0 / (in_features ** 0.5)
    return jax.random.uniform(
        key, (in_features, out_features), dtype=dtype, minval=-bound, maxval=bound)


def _ref_glu(x, w_fc1, w_gate, w_fc2):
    E = x.shape[-1]
    x2 = x.reshape(-1, E)
    h = x2 @ w_fc1
    g = x2 @ w_gate
    y = ((h * jax.nn.sigmoid(h)) * g) @ w_fc2
    return y.reshape(x.shape)


if __name__ == "__main__":
    embed_dim = 128   # lane-dense output (multiple of 128 lanes)
    ffn_dim = 256
    batch, seq = 2, 8

    key = jax.random.PRNGKey(0)
    kx, k1, kg, k2 = jax.random.split(key, 4)

    x = jax.random.normal(kx, (batch, seq, embed_dim), dtype=jnp.float32)
    w_fc1 = _init_linear_weight(k1, embed_dim, ffn_dim)   # (E, F)
    w_gate = _init_linear_weight(kg, embed_dim, ffn_dim)  # (E, F)
    w_fc2 = _init_linear_weight(k2, ffn_dim, embed_dim)   # (F, E)

    ref = _ref_glu(x, w_fc1, w_gate, w_fc2)

    # 1) auto tiling: single ffn tile fast path (weights resident, no acc scratch).
    y = glu_forward(x, w_fc1, w_gate, w_fc2)
    jax.block_until_ready(y)
    assert y.shape == x.shape and y.dtype == x.dtype
    assert jnp.allclose(y, ref, atol=1e-4, rtol=1e-4), "mismatch (single F tile)"

    # 2) forced F tiling: exercises the f32 accumulator across the ffn axis.
    y2 = glu_forward(x, w_fc1, w_gate, w_fc2, tf=128)
    jax.block_until_ready(y2)
    assert jnp.allclose(y2, ref, atol=1e-4, rtol=1e-4), "mismatch (F-tiled)"

    # 3) ragged token count (M = 15) -> padded row tile (rows sliced off).
    x_ragged = jax.random.normal(kx, (3, 5, embed_dim), dtype=jnp.float32)
    y3 = glu_forward(x_ragged, w_fc1, w_gate, w_fc2)
    jax.block_until_ready(y3)
    assert jnp.allclose(y3, _ref_glu(x_ragged, w_fc1, w_gate, w_fc2),
                        atol=1e-4, rtol=1e-4), "mismatch (ragged M)"

    # 4) ragged ffn dim (F = 192) -> zero-padded weights (exact).
    k1b, kgb, k2b = jax.random.split(k2, 3)
    w1b = _init_linear_weight(k1b, embed_dim, 192)
    wgb = _init_linear_weight(kgb, embed_dim, 192)
    w2b = _init_linear_weight(k2b, 192, embed_dim)
    y4 = glu_forward(x, w1b, wgb, w2b)
    jax.block_until_ready(y4)
    assert jnp.allclose(y4, _ref_glu(x, w1b, wgb, w2b),
                        atol=1e-4, rtol=1e-4), "mismatch (ragged F)"

    print("KERNEL_OK")
</pallas_src>

<mosaic_0001>
module attributes {stable_mosaic.version = 11 : i64} {
  func.func @_glu_kernel_single(%arg0: i32, %arg1: memref<16x128xf32, #tpu.memory_space<vmem>>, %arg2: memref<128x256xf32, #tpu.memory_space<vmem>>, %arg3: memref<128x256xf32, #tpu.memory_space<vmem>>, %arg4: memref<256x128xf32, #tpu.memory_space<vmem>>, %arg5: memref<16x128xf32, #tpu.memory_space<vmem>>) attributes {dimension_semantics = [#tpu.dimension_semantics<parallel>], iteration_bounds = array<i64: 1>, scalar_prefetch = 0 : i64, scratch_operands = 0 : i64, tpu.core_type = #tpu.core_type<tc>, window_params = [{transform_indices = @transform_0, window_bounds = array<i64: 16, 128>}, {pipeline_mode = #tpu.pipeline_mode<synchronous>, transform_indices = @transform_1, window_bounds = array<i64: 128, 256>}, {pipeline_mode = #tpu.pipeline_mode<synchronous>, transform_indices = @transform_2, window_bounds = array<i64: 128, 256>}, {pipeline_mode = #tpu.pipeline_mode<synchronous>, transform_indices = @transform_3, window_bounds = array<i64: 256, 128>}, {transform_indices = @transform_4, window_bounds = array<i64: 16, 128>}]} {
    %c0 = arith.constant 0 : index
    %c0_0 = arith.constant 0 : index
    %0 = vector.load %arg1[%c0, %c0_0] : memref<16x128xf32, #tpu.memory_space<vmem>>, vector<16x128xf32>
    %c0_1 = arith.constant 0 : index
    %c0_2 = arith.constant 0 : index
    %1 = vector.load %arg2[%c0_1, %c0_2] : memref<128x256xf32, #tpu.memory_space<vmem>>, vector<128x128xf32>
    %cst = arith.constant dense<0.000000e+00> : vector<16x128xf32>
    %2 = tpu.matmul %0, %1, %cst {dimension_numbers = #tpu.dot_dimension_numbers<[1], [0], [0], [1], [0, 0, 1, 1], [], []>} : vector<16x128xf32>, vector<128x128xf32>, vector<16x128xf32> -> vector<16x128xf32>
    %c0_3 = arith.constant 0 : index
    %c0_4 = arith.constant 0 : index
    %3 = vector.load %arg3[%c0_3, %c0_4] : memref<128x256xf32, #tpu.memory_space<vmem>>, vector<128x128xf32>
    %cst_5 = arith.constant dense<0.000000e+00> : vector<16x128xf32>
    %4 = tpu.matmul %0, %3, %cst_5 {dimension_numbers = #tpu.dot_dimension_numbers<[1], [0], [0], [1], [0, 0, 1, 1], [], []>} : vector<16x128xf32>, vector<128x128xf32>, vector<16x128xf32> -> vector<16x128xf32>
    %cst_6 = arith.constant 0.000000e+00 : f32
    %5 = vector.broadcast %cst_6 : f32 to vector<16x128xf32>
    %6 = arith.subf %5, %2 : vector<16x128xf32>
    %7 = math.exp %6 : vector<16x128xf32>
    %cst_7 = arith.constant 1.000000e+00 : f32
    %8 = vector.broadcast %cst_7 : f32 to vector<16x128xf32>
    %9 = arith.addf %8, %7 : vector<16x128xf32>
    %10 = tpu.reciprocal %9 : vector<16x128xf32> -> vector<16x128xf32>
    %11 = arith.mulf %2, %10 : vector<16x128xf32>
    %12 = arith.mulf %11, %4 : vector<16x128xf32>
    %c0_8 = arith.constant 0 : index
    %c0_9 = arith.constant 0 : index
    %13 = vector.load %arg4[%c0_8, %c0_9] : memref<256x128xf32, #tpu.memory_space<vmem>>, vector<128x128xf32>
    %cst_10 = arith.constant dense<0.000000e+00> : vector<16x128xf32>
    %14 = tpu.matmul %12, %13, %cst_10 {dimension_numbers = #tpu.dot_dimension_numbers<[1], [0], [0], [1], [0, 0, 1, 1], [], []>} : vector<16x128xf32>, vector<128x128xf32>, vector<16x128xf32> -> vector<16x128xf32>
    %c0_11 = arith.constant 0 : index
    %c128 = arith.constant 128 : index
    %15 = vector.load %arg2[%c0_11, %c128] : memref<128x256xf32, #tpu.memory_space<vmem>>, vector<128x128xf32>
    %cst_12 = arith.constant dense<0.000000e+00> : vector<16x128xf32>
    %16 = tpu.matmul %0, %15, %cst_12 {dimension_numbers = #tpu.dot_dimension_numbers<[1], [0], [0], [1], [0, 0, 1, 1], [], []>} : vector<16x128xf32>, vector<128x128xf32>, vector<16x128xf32> -> vector<16x128xf32>
    %c0_13 = arith.constant 0 : index
    %c128_14 = arith.constant 128 : index
    %17 = vector.load %arg3[%c0_13, %c128_14] : memref<128x256xf32, #tpu.memory_space<vmem>>, vector<128x128xf32>
    %cst_15 = arith.constant dense<0.000000e+00> : vector<16x128xf32>
    %18 = tpu.matmul %0, %17, %cst_15 {dimension_numbers = #tpu.dot_dimension_numbers<[1], [0], [0], [1], [0, 0, 1, 1], [], []>} : vector<16x128xf32>, vector<128x128xf32>, vector<16x128xf32> -> vector<16x128xf32>
    %cst_16 = arith.constant 0.000000e+00 : f32
    %19 = vector.broadcast %cst_16 : f32 to vector<16x128xf32>
    %20 = arith.subf %19, %16 : vector<16x128xf32>
    %21 = math.exp %20 : vector<16x128xf32>
    %cst_17 = arith.constant 1.000000e+00 : f32
    %22 = vector.broadcast %cst_17 : f32 to vector<16x128xf32>
    %23 = arith.addf %22, %21 : vector<16x128xf32>
    %24 = tpu.reciprocal %23 : vector<16x128xf32> -> vector<16x128xf32>
    %25 = arith.mulf %16, %24 : vector<16x128xf32>
    %26 = arith.mulf %25, %18 : vector<16x128xf32>
    %c128_18 = arith.constant 128 : index
    %c0_19 = arith.constant 0 : index
    %27 = vector.load %arg4[%c128_18, %c0_19] : memref<256x128xf32, #tpu.memory_space<vmem>>, vector<128x128xf32>
    %cst_20 = arith.constant dense<0.000000e+00> : vector<16x128xf32>
    %28 = tpu.matmul %26, %27, %cst_20 {dimension_numbers = #tpu.dot_dimension_numbers<[1], [0], [0], [1], [0, 0, 1, 1], [], []>} : vector<16x128xf32>, vector<128x128xf32>, vector<16x128xf32> -> vector<16x128xf32>
    %29 = arith.addf %14, %28 : vector<16x128xf32>
    %c0_21 = arith.constant 0 : index
    %c0_22 = arith.constant 0 : index
    %30 = vector.load %arg5[%c0_21, %c0_22] : memref<16x128xf32, #tpu.memory_space<vmem>>, vector<16x128xf32>
    tpu.vector_store %arg5[%c0_21, %c0_22], %29 {strides = array<i32>} : memref<16x128xf32, #tpu.memory_space<vmem>>, vector<16x128xf32>,
    return
  }
  func.func @transform_0(%arg0: i32) -> (i32, i32) {
    %c0_i32 = arith.constant 0 : i32
    %c0_i32_0 = arith.constant 0 : i32
    return %arg0, %c0_i32 : i32, i32
  }
  func.func @transform_1(%arg0: i32) -> (i32, i32) {
    %c0_i32 = arith.constant 0 : i32
    %c0_i32_0 = arith.constant 0 : i32
    %c0_i32_1 = arith.constant 0 : i32
    return %c0_i32, %c0_i32_0 : i32, i32
  }
  func.func @transform_2(%arg0: i32) -> (i32, i32) {
    %c0_i32 = arith.constant 0 : i32
    %c0_i32_0 = arith.constant 0 : i32
    %c0_i32_1 = arith.constant 0 : i32
    return %c0_i32, %c0_i32_0 : i32, i32
  }
  func.func @transform_3(%arg0: i32) -> (i32, i32) {
    %c0_i32 = arith.constant 0 : i32
    %c0_i32_0 = arith.constant 0 : i32
    %c0_i32_1 = arith.constant 0 : i32
    return %c0_i32, %c0_i32_0 : i32, i32
  }
  func.func @transform_4(%arg0: i32) -> (i32, i32) {
    %c0_i32 = arith.constant 0 : i32
    %c0_i32_0 = arith.constant 0 : i32
    return %arg0, %c0_i32 : i32, i32
  }
}

</mosaic_0001>

<bundles_post_ra>
// kernel: tpu_custom_call.1
= control target key start
LH: loop header
LB: loop body
LE: loop exit
PB: predicated region body
PF: predicated region fallthrough
CT: control target
= control target key end

     0   :  { %9 = vsyncpa [#allocation3], 0  ;;  %s679_s0 = inlined_call_operand.hbm [shape: f32[16,128], index: 0, kind: input, shape index: {}]   ;;  %s680_s1 = inlined_call_operand.hbm [shape: f32[128,256], index: 1, kind: input, shape index: {}]   ;;  %s681_s2 = inlined_call_operand.hbm [shape: f32[128,256], index: 2, kind: input, shape index: {}]   ;;  %s682_s3 = inlined_call_operand.hbm [shape: f32[256,128], index: 3, kind: input, shape index: {}]   ;;  %s683_s4 = inlined_call_operand.hbm [shape: f32[16,128], index: 4, kind: output, shape index: {}]  }
   0x1   :  { %10 = vsyncpa [#allocation6], 0 }
   0x2   :  { %11 = vsyncpa [#allocation9], 0  ;;  %s30_s17 = sshll.u32 %s680_s1, 4  ;;  %s31_s17 = int_to_ptr.hbm [resolvable:$true] %s30_s17 }
   0x3   :  { %12 = vsyncpa [#allocation4], 0  ;;  %s605_s18 = smov [#allocation5]   ;;  %s17_s22 = sshll.u32 %s679_s0, 4  ;;  %s18_s22 = int_to_ptr.hbm [resolvable:$true] %s17_s22 }
   0x4   :  { %s32_s19 = sshll.u32 %s605_s18, 4  ;;  %s606_s23 = smov 256   ;;  %s33_s19 = int_to_ptr.vmem [resolvable:$true] %s32_s19 }
   0x5   :  { %s607_s24 = smov 16   ;;  %s608_s25 = smov [#allocation2]  }
   0x6   :  { %38 = dma.hbm_to_vmem [thread:$0]  %s31_s17, 4096, %s33_s19, [#allocation6], %s606_s23, %s606_s23, %s607_s24  }
   0x7   :  { %s19_s26 = sshll.u32 %s608_s25, 4  ;;  %s609_s27 = smov 128   ;;  %s20_s26 = int_to_ptr.vmem [resolvable:$true] %s19_s26 }
   0x8   :  { %s610_s28 = smov 8   ;;  %s43_s30 = sshll.u32 %s681_s2, 4  ;;  %s44_s30 = int_to_ptr.hbm [resolvable:$true] %s43_s30 }
   0x9   :  { %25 = dma.hbm_to_vmem [thread:$0]  %s18_s22, 256, %s20_s26, [#allocation3], %s609_s27, %s609_s27, %s610_s28  }
   0xa   :  { %s611_s5 = smov [#allocation7]   ;;  %s56_s8 = sshll.u32 %s682_s3, 4  ;;  %s57_s8 = int_to_ptr.hbm [resolvable:$true] %s56_s8 }
   0xb   :  { %s45_s0 = sshll.u32 %s611_s5, 4  ;;  %s612_s9 = smov [#allocation8]   ;;  %s46_s0 = int_to_ptr.vmem [resolvable:$true] %s45_s0 }
   0xc   :  { %51 = dma.hbm_to_vmem [thread:$0]  %s44_s30, 4096, %s46_s0, [#allocation6], %s606_s23, %s606_s23, %s607_s24  }
   0xd   :  { %s58_s10 = sshll.u32 %s612_s9, 4  ;;  %s59_s10 = int_to_ptr.vmem [resolvable:$true] %s58_s10 }
   0xe   :  { %64 = dma.hbm_to_vmem [thread:$0]  %s57_s8, 4096, %s59_s10, [#allocation9], %s609_s27, %s609_s27, %s610_s28  }
   0xf   :  { %597 = dma.done.wait [#allocation3], 256  }
  0x10   :  { %598 = vsyncadd [#allocation3], 4294967040 }
  0x11   :  { %599 = dma.done.wait [#allocation6], 8192  }
  0x12   :  { %600 = vsyncadd [#allocation6], 4294959104 }
  0x13   :  { %601 = dma.done.wait [#allocation9], 4096  }
  0x14   :  { %602 = vsyncadd [#allocation9], 4294963200  ;;  %v98_v0 = vld [vmem:[#allocation5 + $0xf0] sm:$0xff]  ;;  %v232_v1 = vld [vmem:[#allocation5 + $0xf8] sm:$0xff]  ;;  %s613_s2 = smov [#allocation10]   ;;  %s405_s13 = sshll.u32 %s683_s4, 4  ;;  %s406_s13 = int_to_ptr.hbm [resolvable:$true] %s405_s13 }
  0x15   :  { %v97_v2 = vld [vmem:[#allocation5 + $0xe0] sm:$0xff]  ;;  %99 = vmatpush.msra.mxu0 %v98_v0  ;;  %233 = vmatpush.msra.mxu2 %v232_v1  ;;  %v231_v3 = vld [vmem:[#allocation5 + $0xe8] sm:$0xff]  ;;  %v96_v4 = vld [vmem:[#allocation5 + $0xd0] sm:$0xff]  ;;  %s403_s3 = sshll.u32 %s613_s2, 4  ;;  %s404_s3 = int_to_ptr.vmem [resolvable:$true] %s403_s3 }
  0x16   :  { %v230_v5 = vld [vmem:[#allocation5 + $0xd8] sm:$0xff]  ;;  %v95_v6 = vld [vmem:[#allocation5 + $0xc0] sm:$0xff]  ;;  %v229_v7 = vld [vmem:[#allocation5 + $0xc8] sm:$0xff] }
  0x17   :  { %100 = vmatpush.msra.mxu0 %v97_v2  ;;  %234 = vmatpush.msra.mxu2 %v231_v3  ;;  %v94_v8 = vld [vmem:[#allocation5 + $0xb0] sm:$0xff]  ;;  %v228_v9 = vld [vmem:[#allocation5 + $0xb8] sm:$0xff]  ;;  %v93_v10 = vld [vmem:[#allocation5 + $0xa0] sm:$0xff] }
  0x18   :  { %v227_v11 = vld [vmem:[#allocation5 + $0xa8] sm:$0xff]  ;;  %v92_v12 = vld [vmem:[#allocation5 + $0x90] sm:$0xff]  ;;  %v226_v13 = vld [vmem:[#allocation5 + $0x98] sm:$0xff] }
  0x19   :  { %101 = vmatpush.msra.mxu0 %v96_v4  ;;  %235 = vmatpush.msra.mxu2 %v230_v5  ;;  %v137_v14 = vld [vmem:[#allocation7 + $0xf0] sm:$0xff]  ;;  %v271_v15 = vld [vmem:[#allocation7 + $0xf8] sm:$0xff]  ;;  %v136_v16 = vld [vmem:[#allocation7 + $0xe0] sm:$0xff] }
  0x1a   :  { %v91_v17 = vld [vmem:[#allocation5 + $0x80] sm:$0xff]  ;;  %v225_v18 = vld [vmem:[#allocation5 + $0x88] sm:$0xff]  ;;  %138 = vmatpush.msra.mxu1 %v137_v14  ;;  %272 = vmatpush.msra.mxu3 %v271_v15  ;;  %v135_v20 = vld [vmem:[#allocation7 + $0xd0] sm:$0xff] }
  0x1b   :  { %102 = vmatpush.msra.mxu0 %v95_v6  ;;  %236 = vmatpush.msra.mxu2 %v229_v7  ;;  %v270_v19 = vld [vmem:[#allocation7 + $0xe8] sm:$0xff]  ;;  %v269_v21 = vld [vmem:[#allocation7 + $0xd8] sm:$0xff]  ;;  %v90_v22 = vld [vmem:[#allocation5 + $0x70] sm:$0xff] }
  0x1c   :  { %v224_v23 = vld [vmem:[#allocation5 + $0x78] sm:$0xff]  ;;  %139 = vmatpush.msra.mxu1 %v136_v16  ;;  %273 = vmatpush.msra.mxu3 %v270_v19  ;;  %v134_v24 = vld [vmem:[#allocation7 + $0xc0] sm:$0xff]  ;;  %v268_v25 = vld [vmem:[#allocation7 + $0xc8] sm:$0xff] }
  0x1d   :  { %103 = vmatpush.msra.mxu0 %v94_v8  ;;  %237 = vmatpush.msra.mxu2 %v228_v9  ;;  %v89_v26 = vld [vmem:[#allocation5 + $0x60] sm:$0xff]  ;;  %v223_v27 = vld [vmem:[#allocation5 + $0x68] sm:$0xff]  ;;  %v133_v28 = vld [vmem:[#allocation7 + $0xb0] sm:$0xff] }
  0x1e   :  { %140 = vmatpush.msra.mxu1 %v135_v20  ;;  %274 = vmatpush.msra.mxu3 %v269_v21  ;;  %v267_v29 = vld [vmem:[#allocation7 + $0xb8] sm:$0xff]  ;;  %v88_v30 = vld [vmem:[#allocation5 + $0x50] sm:$0xff]  ;;  %v132_v32 = vld [vmem:[#allocation7 + $0xa0] sm:$0xff] }
  0x1f   :  { %104 = vmatpush.msra.mxu0 %v93_v10  ;;  %238 = vmatpush.msra.mxu2 %v227_v11  ;;  %v222_v31 = vld [vmem:[#allocation5 + $0x58] sm:$0xff]  ;;  %v266_v33 = vld [vmem:[#allocation7 + $0xa8] sm:$0xff]  ;;  %v87_v34 = vld [vmem:[#allocation5 + $0x40] sm:$0xff] }
  0x20   :  { %141 = vmatpush.msra.mxu1 %v134_v24  ;;  %275 = vmatpush.msra.mxu3 %v268_v25  ;;  %v221_v35 = vld [vmem:[#allocation5 + $0x48] sm:$0xff]  ;;  %v131_v36 = vld [vmem:[#allocation7 + $0x90] sm:$0xff]  ;;  %v265_v37 = vld [vmem:[#allocation7 + $0x98] sm:$0xff] }
  0x21   :  { %105 = vmatpush.msra.mxu0 %v92_v12  ;;  %239 = vmatpush.msra.mxu2 %v226_v13  ;;  %v86_v38 = vld [vmem:[#allocation5 + $0x30] sm:$0xff]  ;;  %v220_v39 = vld [vmem:[#allocation5 + $0x38] sm:$0xff]  ;;  %v130_v40 = vld [vmem:[#allocation7 + $0x80] sm:$0xff] }
  0x22   :  { %142 = vmatpush.msra.mxu1 %v133_v28  ;;  %276 = vmatpush.msra.mxu3 %v267_v29  ;;  %v264_v41 = vld [vmem:[#allocation7 + $0x88] sm:$0xff]  ;;  %v85_v42 = vld [vmem:[#allocation5 + $0x20] sm:$0xff]  ;;  %v129_v44 = vld [vmem:[#allocation7 + $0x70] sm:$0xff] }
  0x23   :  { %106 = vmatpush.msra.mxu0 %v91_v17  ;;  %240 = vmatpush.msra.mxu2 %v225_v18  ;;  %v219_v43 = vld [vmem:[#allocation5 + $0x28] sm:$0xff]  ;;  %v263_v45 = vld [vmem:[#allocation7 + $0x78] sm:$0xff]  ;;  %v84_v46 = vld [vmem:[#allocation5 + $0x10] sm:$0xff] }
  0x24   :  { %143 = vmatpush.msra.mxu1 %v132_v32  ;;  %277 = vmatpush.msra.mxu3 %v266_v33  ;;  %v218_v47 = vld [vmem:[#allocation5 + $0x18] sm:$0xff]  ;;  %v128_v48 = vld [vmem:[#allocation7 + $0x60] sm:$0xff]  ;;  %v262_v49 = vld [vmem:[#allocation7 + $0x68] sm:$0xff] }
  0x25   :  { %107 = vmatpush.msra.mxu0 %v90_v22  ;;  %241 = vmatpush.msra.mxu2 %v224_v23  ;;  %v83_v50 = vld [vmem:[#allocation5] sm:$0xff]  ;;  %v217_v51 = vld [vmem:[#allocation5 + $0x8] sm:$0xff]  ;;  %v81_v52 = vld [vmem:[#allocation2] sm:$0xff] }
  0x26   :  { %144 = vmatpush.msra.mxu1 %v131_v36  ;;  %278 = vmatpush.msra.mxu3 %v265_v37  ;;  %v127_v53 = vld [vmem:[#allocation7 + $0x50] sm:$0xff]  ;;  %v261_v54 = vld [vmem:[#allocation7 + $0x58] sm:$0xff]  ;;  %v126_v55 = vld [vmem:[#allocation7 + $0x40] sm:$0xff] }
  0x27   :  { %108 = vmatpush.msra.mxu0 %v89_v26  ;;  %242 = vmatpush.msra.mxu2 %v223_v27  ;;  %v260_v56 = vld [vmem:[#allocation7 + $0x48] sm:$0xff]  ;;  %v125_v57 = vld [vmem:[#allocation7 + $0x30] sm:$0xff]  ;;  %v259_v58 = vld [vmem:[#allocation7 + $0x38] sm:$0xff] }
  0x28   :  { %145 = vmatpush.msra.mxu1 %v130_v40  ;;  %279 = vmatpush.msra.mxu3 %v264_v41  ;;  %v124_v59 = vld [vmem:[#allocation7 + $0x20] sm:$0xff]  ;;  %v258_v60 = vld [vmem:[#allocation7 + $0x28] sm:$0xff]  ;;  %v82_v61 = vld [vmem:[#allocation2 + $0x8] sm:$0xff] }
  0x29   :  { %109 = vmatpush.msra.mxu0 %v88_v30  ;;  %243 = vmatpush.msra.mxu2 %v222_v31  ;;  %v123_v62 = vld [vmem:[#allocation7 + $0x10] sm:$0xff]  ;;  %v257_v63 = vld [vmem:[#allocation7 + $0x18] sm:$0xff]  ;;  %v122_v0 = vld [vmem:[#allocation7] sm:$0xff] }
  0x2a   :  { %146 = vmatpush.msra.mxu1 %v129_v44  ;;  %280 = vmatpush.msra.mxu3 %v263_v45  ;;  %v256_v1 = vld [vmem:[#allocation7 + $0x8] sm:$0xff]  ;;  %v216_v2 = vld [vmem:[#allocation8 + $0x78] sm:$0xff]  ;;  %v215_v3 = vld [vmem:[#allocation8 + $0x70] sm:$0xff] }
  0x2b   :  { %110 = vmatpush.msra.mxu0 %v87_v34  ;;  %244 = vmatpush.msra.mxu2 %v221_v35  ;;  %v214_v4 = vld [vmem:[#allocation8 + $0x68] sm:$0xff]  ;;  %v350_v5 = vld [vmem:[#allocation8 + $0xf8] sm:$0xff]  ;;  %v213_v6 = vld [vmem:[#allocation8 + $0x60] sm:$0xff] }
  0x2c   :  { %147 = vmatpush.msra.mxu1 %v128_v48  ;;  %281 = vmatpush.msra.mxu3 %v262_v49  ;;  %v349_v7 = vld [vmem:[#allocation8 + $0xf0] sm:$0xff]  ;;  %v212_v8 = vld [vmem:[#allocation8 + $0x58] sm:$0xff]  ;;  %v348_v9 = vld [vmem:[#allocation8 + $0xe8] sm:$0xff] }
  0x2d   :  { %111 = vmatpush.msra.mxu0 %v86_v38  ;;  %245 = vmatpush.msra.mxu2 %v220_v39  ;;  %v211_v10 = vld [vmem:[#allocation8 + $0x50] sm:$0xff]  ;;  %v347_v11 = vld [vmem:[#allocation8 + $0xe0] sm:$0xff]  ;;  %v210_v12 = vld [vmem:[#allocation8 + $0x48] sm:$0xff] }
  0x2e   :  { %148 = vmatpush.msra.mxu1 %v127_v53  ;;  %282 = vmatpush.msra.mxu3 %v261_v54  ;;  %v346_v13 = vld [vmem:[#allocation8 + $0xd8] sm:$0xff]  ;;  %v209_v14 = vld [vmem:[#allocation8 + $0x40] sm:$0xff]  ;;  %v345_v15 = vld [vmem:[#allocation8 + $0xd0] sm:$0xff] }
  0x2f   :  { %112 = vmatpush.msra.mxu0 %v85_v42  ;;  %246 = vmatpush.msra.mxu2 %v219_v43  ;;  %v208_v16 = vld [vmem:[#allocation8 + $0x38] sm:$0xff]  ;;  %v344_v17 = vld [vmem:[#allocation8 + $0xc8] sm:$0xff]  ;;  %v207_v18 = vld [vmem:[#allocation8 + $0x30] sm:$0xff] }
  0x30   :  { %149 = vmatpush.msra.mxu1 %v126_v55  ;;  %283 = vmatpush.msra.mxu3 %v260_v56  ;;  %v343_v19 = vld [vmem:[#allocation8 + $0xc0] sm:$0xff]  ;;  %v206_v20 = vld [vmem:[#allocation8 + $0x28] sm:$0xff]  ;;  %v342_v21 = vld [vmem:[#allocation8 + $0xb8] sm:$0xff] }
  0x31   :  { %113 = vmatpush.msra.mxu0 %v84_v46  ;;  %247 = vmatpush.msra.mxu2 %v218_v47  ;;  %v205_v22 = vld [vmem:[#allocation8 + $0x20] sm:$0xff]  ;;  %v341_v23 = vld [vmem:[#allocation8 + $0xb0] sm:$0xff]  ;;  %v204_v24 = vld [vmem:[#allocation8 + $0x18] sm:$0xff] }
  0x32   :  { %150 = vmatpush.msra.mxu1 %v125_v57  ;;  %284 = vmatpush.msra.mxu3 %v259_v58  ;;  %v340_v25 = vld [vmem:[#allocation8 + $0xa8] sm:$0xff]  ;;  %v203_v26 = vld [vmem:[#allocation8 + $0x10] sm:$0xff]  ;;  %v339_v28 = vld [vmem:[#allocation8 + $0xa0] sm:$0xff] }
  0x33   :  { %114 = vmatpush.msra.mxu0 %v83_v50  ;;  %248 = vmatpush.msra.mxu2 %v217_v51  ;;  %v202_v29 = vld [vmem:[#allocation8 + $0x8] sm:$0xff]  ;;  %v338_v31 = vld [vmem:[#allocation8 + $0x98] sm:$0xff]  ;;  %v201_v32 = vld [vmem:[#allocation8] sm:$0xff] }
  0x34   :  { %115 = vmatmul.f32.vlgmr.msra.gmra.mxu0 %v81_v52  ;;  %249 = vmatmul.f32.vlgmr.msra.gmra.mxu2 %v81_v52  ;;  %v337_v34 = vld [vmem:[#allocation8 + $0x90] sm:$0xff]  ;;  %v336_v36 = vld [vmem:[#allocation8 + $0x88] sm:$0xff]  ;;  %v335_v39 = vld [vmem:[#allocation8 + $0x80] sm:$0xff] }
  0x35   :  { %151 = vmatpush.msra.mxu1 %v124_v59  ;;  %285 = vmatpush.msra.mxu3 %v258_v60 }
  0x36   :  { %351 = vmatpush.msrb.mxu0 %v350_v5  ;;  %420 = vmatpush.msrb.mxu2 %v350_v5 }
  0x37   :  { %152 = vmatpush.msra.mxu1 %v123_v62  ;;  %286 = vmatpush.msra.mxu3 %v257_v63 }
  0x38   :  { %352 = vmatpush.msrb.mxu0 %v349_v7  ;;  %421 = vmatpush.msrb.mxu2 %v349_v7 }
  0x39   :  { %153 = vmatpush.msra.mxu1 %v122_v0  ;;  %287 = vmatpush.msra.mxu3 %v256_v1 }
  0x3a   :  { %154 = vmatmul.f32.vlgmr.msra.gmra.mxu1 %v81_v52  ;;  %288 = vmatmul.f32.vlgmr.msra.gmra.mxu3 %v81_v52 }
  0x3b   :  { %374 = vmatpush.msrb.mxu1 %v216_v2  ;;  %436 = vmatpush.msrb.mxu3 %v216_v2 }
  0x3c   :  { %118 = vmatmul.f32.gmra.mxu0 %v82_v61  ;;  %252 = vmatmul.f32.gmra.mxu2 %v82_v61 }
  0x3d   :  { %375 = vmatpush.msrb.mxu1 %v215_v3  ;;  %437 = vmatpush.msrb.mxu3 %v215_v3 }
  0x3e   :  { %353 = vmatpush.msrb.mxu0 %v348_v9  ;;  %422 = vmatpush.msrb.mxu2 %v348_v9 }
  0x3f   :  { %376 = vmatpush.msrb.mxu1 %v214_v4  ;;  %438 = vmatpush.msrb.mxu3 %v214_v4 }
  0x40   :  { %354 = vmatpush.msrb.mxu0 %v347_v11  ;;  %423 = vmatpush.msrb.mxu2 %v347_v11 }
  0x41   :  { %377 = vmatpush.msrb.mxu1 %v213_v6  ;;  %439 = vmatpush.msrb.mxu3 %v213_v6 }
  0x42   :  { %157 = vmatmul.f32.gmra.mxu1 %v82_v61  ;;  %291 = vmatmul.f32.gmra.mxu3 %v82_v61 }
  0x43   :  { %378 = vmatpush.msrb.mxu1 %v212_v8  ;;  %440 = vmatpush.msrb.mxu3 %v212_v8 }
  0x44   :  { %355 = vmatpush.msrb.mxu0 %v346_v13  ;;  %424 = vmatpush.msrb.mxu2 %v346_v13 }
  0x45   :  { %379 = vmatpush.msrb.mxu1 %v211_v10  ;;  %441 = vmatpush.msrb.mxu3 %v211_v10 }
  0x46   :  { %356 = vmatpush.msrb.mxu0 %v345_v15  ;;  %425 = vmatpush.msrb.mxu2 %v345_v15 }
  0x47   :  { %380 = vmatpush.msrb.mxu1 %v210_v12  ;;  %442 = vmatpush.msrb.mxu3 %v210_v12 }
  0x48   :  { %357 = vmatpush.msrb.mxu0 %v344_v17  ;;  %426 = vmatpush.msrb.mxu2 %v344_v17 }
  0x49   :  { %381 = vmatpush.msrb.mxu1 %v209_v14  ;;  %443 = vmatpush.msrb.mxu3 %v209_v14 }
  0x4a   :  { %358 = vmatpush.msrb.mxu0 %v343_v19  ;;  %427 = vmatpush.msrb.mxu2 %v343_v19 }
  0x4b   :  { %382 = vmatpush.msrb.mxu1 %v208_v16  ;;  %444 = vmatpush.msrb.mxu3 %v208_v16 }
  0x4c   :  { %359 = vmatpush.msrb.mxu0 %v342_v21  ;;  %428 = vmatpush.msrb.mxu2 %v342_v21 }
  0x4d   :  { %383 = vmatpush.msrb.mxu1 %v207_v18  ;;  %445 = vmatpush.msrb.mxu3 %v207_v18 }
  0x4e   :  { %360 = vmatpush.msrb.mxu0 %v341_v23  ;;  %429 = vmatpush.msrb.mxu2 %v341_v23 }
  0x4f   :  { %384 = vmatpush.msrb.mxu1 %v206_v20  ;;  %446 = vmatpush.msrb.mxu3 %v206_v20 }
  0x50   :  { %361 = vmatpush.msrb.mxu0 %v340_v25  ;;  %430 = vmatpush.msrb.mxu2 %v340_v25 }
  0x51   :  { %385 = vmatpush.msrb.mxu1 %v205_v22  ;;  %447 = vmatpush.msrb.mxu3 %v205_v22 }
  0x52   :  { %362 = vmatpush.msrb.mxu0 %v339_v28  ;;  %431 = vmatpush.msrb.mxu2 %v339_v28 }
  0x53   :  { %386 = vmatpush.msrb.mxu1 %v204_v24  ;;  %448 = vmatpush.msrb.mxu3 %v204_v24 }
  0x54   :  { %363 = vmatpush.msrb.mxu0 %v338_v31  ;;  %432 = vmatpush.msrb.mxu2 %v338_v31 }
  0x55   :  { %387 = vmatpush.msrb.mxu1 %v203_v26  ;;  %449 = vmatpush.msrb.mxu3 %v203_v26 }
  0x56   :  { %364 = vmatpush.msrb.mxu0 %v337_v34  ;;  %433 = vmatpush.msrb.mxu2 %v337_v34 }
  0x57   :  { %388 = vmatpush.msrb.mxu1 %v202_v29  ;;  %450 = vmatpush.msrb.mxu3 %v202_v29 }
  0x58   :  { %365 = vmatpush.msrb.mxu0 %v336_v36  ;;  %434 = vmatpush.msrb.mxu2 %v336_v36 }
  0x59   :  { %389 = vmatpush.msrb.mxu1 %v201_v32  ;;  %451 = vmatpush.msrb.mxu3 %v201_v32 }
  0x5a   :  { %366 = vmatpush.msrb.mxu0 %v335_v39  ;;  %435 = vmatpush.msrb.mxu2 %v335_v39 }
  0xb1   :  { %v657_v27 = vpop.f32.mrf.mxu0 }
  0xb2   :  { %v161_v30 = vsub.f32 0.0, %v657_v27 }
  0xb4   :  { %v163_v33 = vmul.f32 1.442695, %v161_v30 }
  0xb6   :  { %461 = vpow2.f32 %v163_v33 }
  0xb7   :  { %v660_v35 = vpop.f32.mrf.mxu2  ;;  %v155_v4 = vpop.f32.mrf.mxu1 }
  0xb8   :  { %v295_v37 = vsub.f32 0.0, %v660_v35 }
  0xb9   :  { %v663_v38 = vpop.f32.mrf.mxu0 }
  0xba   :  { %v297_v40 = vmul.f32 1.442695, %v295_v37  ;;  %v162_v41 = vsub.f32 0.0, %v663_v38 }
  0xbc   :  { %v462_v42 = vpop.eup %461  ;;  %463 = vpow2.f32 %v297_v40  ;;  %v165_v43 = vmul.f32 1.442695, %v162_v41 }
  0xbd   :  { %v167_v44 = vadd.f32 1.0, %v462_v42  ;;  %v289_v18 = vpop.f32.mrf.mxu3 }
  0xbe   :  { %465 = vpow2.f32 %v165_v43 }
  0xbf   :  { %467 = vrcp.f32 %v167_v44  ;;  %v666_v45 = vpop.f32.mrf.mxu2  ;;  %v180_v55 = vand.u32 2147483648, %v167_v44  ;;  %vm174_vm0 = vweird.f32 %v167_v44  ;;  %v178_v58 = vand.u32 2147483647, %v167_v44  ;;  %v158_v32 = vpop.f32.mrf.mxu1 }
  0xc0   :  { %v296_v46 = vsub.f32 0.0, %v666_v45 }
  0xc1   :  { %v181_v63 = vor.u32 1.1754944e-38, %v180_v55  ;;  %vm179_vm3 = vcmp.eq.f32.partialorder %v178_v58, 8.507059e+37 }
  0xc2   :  { %v464_v47 = vpop.eup %463  ;;  %v299_v48 = vmul.f32 1.442695, %v296_v46 }
  0xc3   :  { %v301_v49 = vadd.f32 1.0, %v464_v47 }
  0xc4   :  { %v466_v50 = vpop.eup %465  ;;  %469 = vpow2.f32 %v299_v48 }
  0xc5   :  { %v468_v51 = vpop.eup %467  ;;  %471 = vrcp.f32 %v301_v49  ;;  %v168_v53 = vadd.f32 1.0, %v466_v50  ;;  %v314_v3 = vand.u32 2147483648, %v301_v49  ;;  %v312_v9 = vand.u32 2147483647, %v301_v49  ;;  %v292_v40 = vpop.f32.mrf.mxu3 }
  0xc6   :  { %v170_v52 = vmul.f32 %v468_v51, %v167_v44  ;;  %vm175_vm1 = vweird.f32 %v468_v51  ;;  %vm308_vm5 = vweird.f32 %v301_v49 }
  0xc7   :  { %473 = vrcp.f32 %v168_v53  ;;  %vm176_vm2 = vmor %vm174_vm0, %vm175_vm1  ;;  %v315_v12 = vor.u32 1.1754944e-38, %v314_v3  ;;  %v194_v13 = vand.u32 2147483648, %v168_v53  ;;  %vm188_vm7 = vweird.f32 %v168_v53 }
  0xc8   :  { %v171_v54 = vsub.f32 1.0, %v170_v52  ;;  %v192_v17 = vand.u32 2147483647, %v168_v53  ;;  %vm313_vm9 = vcmp.eq.f32.partialorder %v312_v9, 8.507059e+37 }
  0xc9   :  { %v195_v24 = vor.u32 1.1754944e-38, %v194_v13 }
  0xca   :  { %v470_v56 = vpop.eup %469  ;;  %v172_v57 = vmul.f32 %v468_v51, %v171_v54  ;;  %vm193_vm11 = vcmp.eq.f32.partialorder %v192_v17, 8.507059e+37 }
  0xcb   :  { %v472_v59 = vpop.eup %471  ;;  %v302_v60 = vadd.f32 1.0, %v470_v56 }
  0xcc   :  { %v173_v61 = vadd.f32 %v468_v51, %v172_v57  ;;  %v304_v62 = vmul.f32 %v472_v59, %v301_v49  ;;  %vm309_vm4 = vweird.f32 %v472_v59 }
  0xcd   :  { %475 = vrcp.f32 %v302_v60  ;;  %v474_v0 = vpop.eup %473  ;;  %vm310_vm6 = vmor %vm308_vm5, %vm309_vm4  ;;  %v328_v28 = vand.u32 2147483648, %v302_v60  ;;  %vm322_vm13 = vweird.f32 %v302_v60 }
  0xce   :  { %v177_v1 = vsel %vm176_vm2, %v468_v51, %v173_v61  ;;  %v305_v2 = vsub.f32 1.0, %v304_v62  ;;  %v184_v6 = vmul.f32 %v474_v0, %v168_v53  ;;  %vm189_vm8 = vweird.f32 %v474_v0 }
  0xcf   :  { %v182_v5 = vsel %vm179_vm3, %v181_v63, %v177_v1  ;;  %vm190_vm10 = vmor %vm188_vm7, %vm189_vm8  ;;  %v329_v36 = vor.u32 1.1754944e-38, %v328_v28 }
  0xd0   :  { %v197_v7 = vmul.f32 %v182_v5, %v657_v27  ;;  %v306_v8 = vmul.f32 %v472_v59, %v305_v2  ;;  %v185_v10 = vsub.f32 1.0, %v184_v6  ;;  %v326_v27 = vand.u32 2147483647, %v302_v60 }
  0xd2   :  { %v307_v11 = vadd.f32 %v472_v59, %v306_v8  ;;  %v199_v14 = vmul.f32 %v197_v7, %v155_v4  ;;  %v186_v16 = vmul.f32 %v474_v0, %v185_v10  ;;  %vm327_vm15 = vcmp.eq.f32.partialorder %v326_v27, 8.507059e+37 }
  0xd3   :  { %v476_v15 = vpop.eup %475 }
  0xd4   :  { %v311_v19 = vsel %vm310_vm6, %v472_v59, %v307_v11  ;;  %v318_v20 = vmul.f32 %v476_v15, %v302_v60  ;;  %390 = vmatmul.f32.vlgmr.msrb.gmra.mxu1 %v199_v14  ;;  %v187_v22 = vadd.f32 %v474_v0, %v186_v16  ;;  %vm323_vm12 = vweird.f32 %v476_v15 }
  0xd5   :  { %v316_v21 = vsel %vm313_vm9, %v315_v12, %v311_v19  ;;  %vm324_vm14 = vmor %vm322_vm13, %vm323_vm12 }
  0xd6   :  { %v331_v23 = vmul.f32 %v316_v21, %v660_v35  ;;  %v319_v25 = vsub.f32 1.0, %v318_v20  ;;  %v191_v26 = vsel %vm190_vm10, %v474_v0, %v187_v22 }
  0xd7   :  { %v196_v29 = vsel %vm193_vm11, %v195_v24, %v191_v26 }
  0xd8   :  { %v320_v30 = vmul.f32 %v476_v15, %v319_v25  ;;  %v333_v31 = vmul.f32 %v331_v23, %v289_v18  ;;  %v198_v33 = vmul.f32 %v196_v29, %v663_v38 }
  0xda   :  { %v321_v34 = vadd.f32 %v476_v15, %v320_v30  ;;  %367 = vmatmul.f32.vlgmr.msrb.gmra.mxu0 %v333_v31  ;;  %v200_v35 = vmul.f32 %v198_v33, %v158_v32 }
  0xdc   :  { %v325_v37 = vsel %vm324_vm14, %v476_v15, %v321_v34  ;;  %393 = vmatmul.f32.vlgmr.msrb.gmra.mxu3 %v200_v35 }
  0xdd   :  { %v330_v39 = vsel %vm327_vm15, %v329_v36, %v325_v37 }
  0xde   :  { %v332_v41 = vmul.f32 %v330_v39, %v666_v45 }
  0xe0   :  { %v334_v42 = vmul.f32 %v332_v41, %v292_v40 }
  0xe2   :  { %370 = vmatmul.f32.vlgmr.msrb.gmra.mxu2 %v334_v42 }
 0x151   :  { %v391_v43 = vpop.f32.mrf.mxu1 }
 0x157   :  { %v368_v44 = vpop.f32.mrf.mxu0 }
 0x158   :  { %v392_v46 = vadd.f32 %v391_v43, %v368_v44 }
 0x15a   :  { %397 = vst [vmem:[#allocation10] sm:$0xff] %v392_v46 }
 0x15f   :  { %v394_v38 = vpop.f32.mrf.mxu3 }
 0x165   :  { %v371_v47 = vpop.f32.mrf.mxu2 }
 0x166   :  { %v395_v48 = vadd.f32 %v394_v38, %v371_v47 }
 0x168   :  { %398 = vst [vmem:[#allocation10 + $0x8] sm:$0xff] %v395_v48 }
 0x169   :  { %411 = dma.vmem_to_hbm [thread:$0]  %s404_s3, 256, %s406_s13, [#allocation4], %s609_s27, %s609_s27, %s610_s28  }
 0x16a   :  { %603 = dma.done.wait [#allocation4], 256  }
 0x16b   :  { %604 = vsyncadd [#allocation4], 4294967040 }
 0x16c   :  { %416 = vsyncpa [#allocation3], 1 }
 0x16d   :  { %417 = vsyncpa [#allocation6], 1 }
 0x16e   :  { %418 = vsyncpa [#allocation9], 1 }
 0x16f   :  { %419 = vsyncpa [#allocation4], 1 }

</bundles_post_ra>
